<compile_context>
chip_gen: v5e
topology: v5e:2x2
jax: 0.10.0
libtpu: 0.0.40
codegen_flags: <defaults>
</compile_context>

<pallas_src>
import functools

import jax
import jax.numpy as jnp
from jax.experimental import pallas as pl
from jax.experimental.pallas import tpu as pltpu

LANE = 128
SUBLANE = 8


def _round_up(n, m):
    return ((n + m - 1) // m) * m


def _cdiv(a, b):
    return (a + b - 1) // b


def _pick_batch_tiling(B, bm):
    """Pick (tile, grid_n, B_pad): tile is a multiple of 128 lanes, grid is even
    whenever it has more than one step (v7x megacore), padding kept small."""
    bm = max(LANE, _round_up(bm, LANE))
    if B <= LANE:
        return LANE, 1, LANE
    # Aim for >= 2 grid steps with the biggest tiles possible (<= bm).
    tile = max(LANE, min(bm, _round_up(_cdiv(B, 2), LANE)))
    grid_n = _cdiv(B, tile)
    if grid_n > 1 and grid_n % 2 == 1:
        # Keep the parallel grid even for v7x's two TensorCores: shrink the tile
        # slightly instead of padding a whole extra tile of batch rows.
        tile = max(LANE, min(bm, _round_up(_cdiv(B, grid_n + 1), LANE)))
        grid_n = _cdiv(B, tile)
        if grid_n > 1 and grid_n % 2 == 1:
            grid_n += 1  # rare (bm cap re-introduced oddness): eat one padded tile
    B_pad = grid_n * tile
    return tile, grid_n, B_pad


def fcnn_kernel(x_ref, w1_ref, b1_ref, w2_ref, b2_ref, w3_ref, b3_ref, o_ref):
    # x_ref:  (in_dim, tile)        -- batch on lanes
    # wN_ref: (fan_out, fan_in)     -- io_dtype (f32 or bf16)
    # bN_ref: (fan_out, 1)          -- f32, broadcasts over lanes
    # o_ref:  (out_sub, tile)       -- sublane-padded, lane-dense output
    xT = x_ref[...]
    h1 = jnp.tanh(
        jnp.dot(w1_ref[...], xT, preferred_element_type=jnp.float32) + b1_ref[...]
    )
    h1 = h1.astype(w2_ref.dtype)  # bf16 path: feed the MXU natively; no-op for f32
    h2 = jnp.tanh(
        jnp.dot(w2_ref[...], h1, preferred_element_type=jnp.float32) + b2_ref[...]
    )
    h2 = h2.astype(w3_ref.dtype)
    y = jnp.dot(w3_ref[...], h2, preferred_element_type=jnp.float32) + b3_ref[...]
    o_ref[...] = y.astype(o_ref.dtype)
    # TODO(synk): if bundle dumps ever show VMEM ld/st slot_util > ~50% at very
    # large tiles, add an inner lax.fori_loop(unroll=True) over ~256-lane
    # sub-tiles so h1/h2 stay in vregs between layers.


@functools.partial(jax.jit, static_argnames=("bm", "io_dtype"))
def fcnn_forward(x, w1, b1, w2, b2, w3, b3, *, bm=4096, io_dtype=jnp.float32):
    """x: (B, in_dim); wN: (fan_out, fan_in); bN: (fan_out, 1). Returns (B, out_dim)."""
    B, in_dim = x.shape
    out_dim = w3.shape[0]
    out_dtype = x.dtype

    # ---- sublane-pad the last layer: 2 -> 8 rows (was 2 -> 128 lanes) ---------
    out_sub = _round_up(out_dim, SUBLANE)
    if out_sub != out_dim:
        w3 = jnp.pad(w3, ((0, out_sub - out_dim), (0, 0)))
        b3 = jnp.pad(b3, ((0, out_sub - out_dim), (0, 0)))

    # ---- batch tiling: large lane tiles, even parallel grid -------------------
    tile, grid_n, B_pad = _pick_batch_tiling(B, bm)
    if B_pad != B:
        x = jnp.pad(x, ((0, B_pad - B), (0, 0)))  # ragged batch -> zero-pad rows
    xT = jnp.transpose(x).astype(io_dtype)        # (in_dim, B_pad), batch on lanes

    # bf16 I/O (v6e/v7x) halves HBM bytes; biases are tiny so keep them f32.
    w1 = w1.astype(io_dtype)
    w2 = w2.astype(io_dtype)
    w3 = w3.astype(io_dtype)
    b1 = b1.astype(jnp.float32)
    b2 = b2.astype(jnp.float32)
    b3 = b3.astype(jnp.float32)

    # Weights/biases: fully VMEM-resident, not pipelined / double-buffered.
    resident = pl.BlockSpec(memory_space=pltpu.MemorySpace.VMEM)

    outT = pl.pallas_call(
        fcnn_kernel,
        out_shape=jax.ShapeDtypeStruct((out_sub, B_pad), io_dtype),
        grid=(grid_n,),
        in_specs=[
            pl.BlockSpec((in_dim, tile), lambda i: (0, i)),  # x^T: batch-tiled on lanes
            resident,  # W1
            resident,  # b1
            resident,  # W2
            resident,  # b2
            resident,  # W3 (sublane-padded)
            resident,  # b3 (sublane-padded)
        ],
        out_specs=pl.BlockSpec((out_sub, tile), lambda i: (0, i)),
        compiler_params=pltpu.CompilerParams(
            dimension_semantics=("parallel",),
        ),
        # TODO(synk): if hidden_dim ever grows so a resident hidden x hidden W2
        # approaches v7x's 32 MiB scoped VMEM (hidden ~ 2896 in f32), tile the
        # hidden axis as an "arbitrary" reduction and set vmem_limit_bytes.
    )(xT, w1, b1, w2, b2, w3, b3)

    # Only an (out_sub, B_pad) = (8, B_pad) slab to un-pad / transpose back.
    return jnp.transpose(outT[:out_dim, :B]).astype(out_dtype)


def init_fcnn_params(key, in_dim, hidden_dim, out_dim, dtype=jnp.float32):
    """PyTorch nn.Linear-style init, stored in PyTorch (fan_out, fan_in) layout;
    biases stored as (fan_out, 1)."""
    keys = jax.random.split(key, 6)

    def lin(kw, kb, fan_in, fan_out):
        bound = 1.0 / jnp.sqrt(fan_in)
        w = jax.random.uniform(kw, (fan_out, fan_in), dtype, -bound, bound)
        b = jax.random.uniform(kb, (fan_out, 1), dtype, -bound, bound)
        return w, b

    w1, b1 = lin(keys[0], keys[1], in_dim, hidden_dim)
    w2, b2 = lin(keys[2], keys[3], hidden_dim, hidden_dim)
    w3, b3 = lin(keys[4], keys[5], hidden_dim, out_dim)
    return w1, b1, w2, b2, w3, b3


def fcnn_reference(x, w1, b1, w2, b2, w3, b3):
    h1 = jnp.tanh(x @ w1.T + b1.T)
    h2 = jnp.tanh(h1 @ w2.T + b2.T)
    return h2 @ w3.T + b3.T


if __name__ == "__main__":
    # Shapes consistent with the module: FCNN(in_dim=4, out_dim=2, hidden_dim=32)
    in_dim, hidden_dim, out_dim = 4, 32, 2

    key = jax.random.PRNGKey(0)
    k_x1, k_x2, k_x3, k_p = jax.random.split(key, 4)
    params = init_fcnn_params(k_p, in_dim, hidden_dim, out_dim)

    # Tolerances: both kernel and reference run MXU matmuls at default (reduced)
    # f32 precision, so compare at 1e-3 (f32 I/O) / 5e-2 (bf16 I/O).

    # Case 1: small even batch (single 128-lane tile, f32 I/O).
    x1 = jax.random.normal(k_x1, (16, in_dim), jnp.float32)
    out1 = jax.block_until_ready(fcnn_forward(x1, *params))
    ref1 = fcnn_reference(x1, *params)
    assert out1.shape == (16, out_dim)
    assert jnp.allclose(out1, ref1, atol=1e-3, rtol=1e-3), (
        f"f32 even batch: max abs err = {jnp.max(jnp.abs(out1 - ref1))}"
    )

    # Case 2: ragged batch (exercises wrapper-side batch padding, f32 I/O).
    x2 = jax.random.normal(k_x2, (50, in_dim), jnp.float32)
    out2 = jax.block_until_ready(fcnn_forward(x2, *params))
    ref2 = fcnn_reference(x2, *params)
    assert out2.shape == (50, out_dim)
    assert jnp.allclose(out2, ref2, atol=1e-3, rtol=1e-3), (
        f"f32 ragged batch: max abs err = {jnp.max(jnp.abs(out2 - ref2))}"
    )

    # Case 3: multi-tile even grid (2 steps) with bf16 HBM I/O (v6e/v7x path).
    x3 = jax.random.normal(k_x3, (300, in_dim), jnp.float32)
    out3 = jax.block_until_ready(fcnn_forward(x3, *params, io_dtype=jnp.bfloat16))
    ref3 = fcnn_reference(x3, *params)
    assert out3.shape == (300, out_dim)
    assert jnp.allclose(out3, ref3, atol=5e-2, rtol=5e-2), (
        f"bf16 multi-tile: max abs err = {jnp.max(jnp.abs(out3 - ref3))}"
    )

    print("KERNEL_OK")
</pallas_src>

<mosaic_0001>
module attributes {stable_mosaic.version = 11 : i64} {
  func.func @fcnn_kernel(%arg0: i32, %arg1: memref<4x128xf32, #tpu.memory_space<vmem>>, %arg2: memref<32x4xf32, #tpu.memory_space<vmem>>, %arg3: memref<32x1xf32, #tpu.memory_space<vmem>>, %arg4: memref<32x32xf32, #tpu.memory_space<vmem>>, %arg5: memref<32x1xf32, #tpu.memory_space<vmem>>, %arg6: memref<8x32xf32, #tpu.memory_space<vmem>>, %arg7: memref<8x1xf32, #tpu.memory_space<vmem>>, %arg8: memref<8x128xf32, #tpu.memory_space<vmem>>) attributes {dimension_semantics = [#tpu.dimension_semantics<parallel>], iteration_bounds = array<i64: 1>, scalar_prefetch = 0 : i64, scratch_operands = 0 : i64, tpu.core_type = #tpu.core_type<tc>, window_params = [{transform_indices = @transform_0, window_bounds = array<i64: 4, 128>}, {pipeline_mode = #tpu.pipeline_mode<synchronous>, transform_indices = @transform_1, window_bounds = array<i64: 32, 4>}, {pipeline_mode = #tpu.pipeline_mode<synchronous>, transform_indices = @transform_2, window_bounds = array<i64: 32, 1>}, {pipeline_mode = #tpu.pipeline_mode<synchronous>, transform_indices = @transform_3, window_bounds = array<i64: 32, 32>}, {pipeline_mode = #tpu.pipeline_mode<synchronous>, transform_indices = @transform_4, window_bounds = array<i64: 32, 1>}, {pipeline_mode = #tpu.pipeline_mode<synchronous>, transform_indices = @transform_5, window_bounds = array<i64: 8, 32>}, {pipeline_mode = #tpu.pipeline_mode<synchronous>, transform_indices = @transform_6, window_bounds = array<i64: 8, 1>}, {transform_indices = @transform_7, window_bounds = array<i64: 8, 128>}]} {
    %c0 = arith.constant 0 : index
    %c0_0 = arith.constant 0 : index
    %0 = vector.load %arg1[%c0, %c0_0] : memref<4x128xf32, #tpu.memory_space<vmem>>, vector<4x128xf32>
    %c0_1 = arith.constant 0 : index
    %c0_2 = arith.constant 0 : index
    %1 = vector.load %arg2[%c0_1, %c0_2] : memref<32x4xf32, #tpu.memory_space<vmem>>, vector<32x4xf32>
    %cst = arith.constant dense<0.000000e+00> : vector<32x128xf32>
    %2 = tpu.matmul %1, %0, %cst {dimension_numbers = #tpu.dot_dimension_numbers<[1], [0], [0], [1], [0, 0, 1, 1], [], []>} : vector<32x4xf32>, vector<4x128xf32>, vector<32x128xf32> -> vector<32x128xf32>
    %c0_3 = arith.constant 0 : index
    %c0_4 = arith.constant 0 : index
    %3 = vector.load %arg3[%c0_3, %c0_4] : memref<32x1xf32, #tpu.memory_space<vmem>>, vector<32x1xf32>
    %4 = vector.broadcast %3 : vector<32x1xf32> to vector<32x128xf32>
    %5 = arith.addf %2, %4 : vector<32x128xf32>
    %6 = math.tanh %5 : vector<32x128xf32>
    %c0_5 = arith.constant 0 : index
    %c0_6 = arith.constant 0 : index
    %7 = vector.load %arg4[%c0_5, %c0_6] : memref<32x32xf32, #tpu.memory_space<vmem>>, vector<32x32xf32>
    %cst_7 = arith.constant dense<0.000000e+00> : vector<32x128xf32>
    %8 = tpu.matmul %7, %6, %cst_7 {dimension_numbers = #tpu.dot_dimension_numbers<[1], [0], [0], [1], [0, 0, 1, 1], [], []>} : vector<32x32xf32>, vector<32x128xf32>, vector<32x128xf32> -> vector<32x128xf32>
    %c0_8 = arith.constant 0 : index
    %c0_9 = arith.constant 0 : index
    %9 = vector.load %arg5[%c0_8, %c0_9] : memref<32x1xf32, #tpu.memory_space<vmem>>, vector<32x1xf32>
    %10 = vector.broadcast %9 : vector<32x1xf32> to vector<32x128xf32>
    %11 = arith.addf %8, %10 : vector<32x128xf32>
    %12 = math.tanh %11 : vector<32x128xf32>
    %c0_10 = arith.constant 0 : index
    %c0_11 = arith.constant 0 : index
    %13 = vector.load %arg6[%c0_10, %c0_11] : memref<8x32xf32, #tpu.memory_space<vmem>>, vector<8x32xf32>
    %cst_12 = arith.constant dense<0.000000e+00> : vector<8x128xf32>
    %14 = tpu.matmul %13, %12, %cst_12 {dimension_numbers = #tpu.dot_dimension_numbers<[1], [0], [0], [1], [0, 0, 1, 1], [], []>} : vector<8x32xf32>, vector<32x128xf32>, vector<8x128xf32> -> vector<8x128xf32>
    %c0_13 = arith.constant 0 : index
    %c0_14 = arith.constant 0 : index
    %15 = vector.load %arg7[%c0_13, %c0_14] : memref<8x1xf32, #tpu.memory_space<vmem>>, vector<8x1xf32>
    %16 = vector.broadcast %15 : vector<8x1xf32> to vector<8x128xf32>
    %17 = arith.addf %14, %16 : vector<8x128xf32>
    %c0_15 = arith.constant 0 : index
    %c0_16 = arith.constant 0 : index
    %18 = vector.load %arg8[%c0_15, %c0_16] : memref<8x128xf32, #tpu.memory_space<vmem>>, vector<8x128xf32>
    tpu.vector_store %arg8[%c0_15, %c0_16], %17 {strides = array<i32>} : memref<8x128xf32, #tpu.memory_space<vmem>>, vector<8x128xf32>,
    return
  }
  func.func @transform_0(%arg0: i32) -> (i32, i32) {
    %c0_i32 = arith.constant 0 : i32
    %c0_i32_0 = arith.constant 0 : i32
    return %c0_i32, %arg0 : i32, i32
  }
  func.func @transform_1(%arg0: i32) -> (i32, i32) {
    %c0_i32 = arith.constant 0 : i32
    %c0_i32_0 = arith.constant 0 : i32
    %c0_i32_1 = arith.constant 0 : i32
    return %c0_i32, %c0_i32_0 : i32, i32
  }
  func.func @transform_2(%arg0: i32) -> (i32, i32) {
    %c0_i32 = arith.constant 0 : i32
    %c0_i32_0 = arith.constant 0 : i32
    %c0_i32_1 = arith.constant 0 : i32
    return %c0_i32, %c0_i32_0 : i32, i32
  }
  func.func @transform_3(%arg0: i32) -> (i32, i32) {
    %c0_i32 = arith.constant 0 : i32
    %c0_i32_0 = arith.constant 0 : i32
    %c0_i32_1 = arith.constant 0 : i32
    return %c0_i32, %c0_i32_0 : i32, i32
  }
  func.func @transform_4(%arg0: i32) -> (i32, i32) {
    %c0_i32 = arith.constant 0 : i32
    %c0_i32_0 = arith.constant 0 : i32
    %c0_i32_1 = arith.constant 0 : i32
    return %c0_i32, %c0_i32_0 : i32, i32
  }
  func.func @transform_5(%arg0: i32) -> (i32, i32) {
    %c0_i32 = arith.constant 0 : i32
    %c0_i32_0 = arith.constant 0 : i32
    %c0_i32_1 = arith.constant 0 : i32
    return %c0_i32, %c0_i32_0 : i32, i32
  }
  func.func @transform_6(%arg0: i32) -> (i32, i32) {
    %c0_i32 = arith.constant 0 : i32
    %c0_i32_0 = arith.constant 0 : i32
    %c0_i32_1 = arith.constant 0 : i32
    return %c0_i32, %c0_i32_0 : i32, i32
  }
  func.func @transform_7(%arg0: i32) -> (i32, i32) {
    %c0_i32 = arith.constant 0 : i32
    %c0_i32_0 = arith.constant 0 : i32
    return %c0_i32, %arg0 : i32, i32
  }
}

</mosaic_0001>

<bundles_post_ra>
// kernel: fcnn_forward.1
= control target key start
LH: loop header
LB: loop body
LE: loop exit
PB: predicated region body
PF: predicated region fallthrough
CT: control target
= control target key end

     0   :  { %vm68_vm0 = vcmask 1043456   ;;  %vm55_vm1 = vcmask 31744   ;;  %v249_v2 = vmov 0   ;;  %vm133_vm2 = vcmask 261120   ;;  %s359_s0 = inlined_call_operand.vmem [shape: f32[4,128], index: 0, kind: input, shape index: {}]   ;;  %s360_s1 = inlined_call_operand.vmem [shape: f32[32,4], index: 1, kind: input, shape index: {}]   ;;  %s361_s2 = inlined_call_operand.vmem [shape: f32[32,1], index: 2, kind: input, shape index: {}]   ;;  %s362_s4 = inlined_call_operand.vmem [shape: f32[32,1], index: 4, kind: input, shape index: {}]   ;;  %s363_s6 = inlined_call_operand.vmem [shape: f32[8,1], index: 6, kind: input, shape index: {}]   ;;  %s364_s3 = inlined_call_operand.vmem [shape: f32[32,32], index: 3, kind: input, shape index: {}]   ;;  %s365_s5 = inlined_call_operand.vmem [shape: f32[8,32], index: 5, kind: input, shape index: {}]   ;;  %s366_s7 = inlined_call_operand.vmem [shape: f32[8,128], index: 7, kind: output, shape index: {}]  }
   0x1   :  { %v26_v0 = vld [vmem:[%s359_s0] sm:$0xf]  ;;  %231 = vset.pattern.permute.xlu1 %v249_v2  ;;  %230 = vset.pattern.permute.xlu0 %v249_v2  ;;  %v30_v3 = vld [vmem:[%s360_s1 + $0x18] sm:$0xff]  ;;  %v32_v5 = vld [vmem:[%s361_s2 + $0x8] sm:$0xff] }
   0x2   :  { %v27_v1 = vld [vmem:[%s360_s1] sm:$0xff]  ;;  %214 = vmatpush.msk.msra.mxu0 %vm68_vm0, %v26_v0  ;;  %224 = vmatpush.msk.msra.mxu2 %vm68_vm0, %v26_v0  ;;  %v34_v4 = vld [vmem:[%s361_s2 + $0x18] sm:$0xff]  ;;  %v28_v6 = vld [vmem:[%s360_s1 + $0x8] sm:$0xff] }
   0x3   :  { %215 = vmatmul.msk.f32.vlgmr.msra.gmra.mxu0 %vm55_vm1, %v27_v1  ;;  %218 = vmatmul.msk.f32.vlgmr.msra.gmra.mxu2 %vm55_vm1, %v30_v3  ;;  %v33_v7 = vld [vmem:[%s361_s2 + $0x10] sm:$0xff]  ;;  %v31_v8 = vld [vmem:[%s361_s2] sm:$0xff]  ;;  %v110_v10 = vld [vmem:[%s362_s4 + $0x8] sm:$0xff] }
   0x4   :  { %52 = vperm.xlu0 %230, %v34_v4   ;;  %42 = vperm.xlu1 %231, %v32_v5   ;;  %v29_v9 = vld [vmem:[%s360_s1 + $0x10] sm:$0xff]  ;;  %v109_v11 = vld [vmem:[%s362_s4] sm:$0xff]  ;;  %v112_v17 = vld [vmem:[%s362_s4 + $0x18] sm:$0xff] }
   0x5   :  { %232 = vset.pattern.permute.xlu2 %v249_v2  ;;  %v111_v19 = vld [vmem:[%s362_s4 + $0x10] sm:$0xff]  ;;  %v180_v27 = vld [vmem:[%s363_s6] sm:$0xff]  ;;  %v106_v33 = vld [vmem:[%s364_s3 + $0x8] sm:$0xff] }
   0x6   :  { %130 = vperm.xlu2 %232, %v112_v17   ;;  %v105_v30 = vld [vmem:[%s364_s3] sm:$0xff]  ;;  %v107_v31 = vld [vmem:[%s364_s3 + $0x10] sm:$0xff]  ;;  %v108_v34 = vld [vmem:[%s364_s3 + $0x18] sm:$0xff] }
   0x7   :  { %v179_v50 = vld [vmem:[%s365_s5] sm:$0xff] }
   0xb   :  { %216 = vmatmul.msk.f32.gmra.mxu0 %vm55_vm1, %v28_v6 }
   0xc   :  { %47 = vperm.xlu0 %230, %v33_v7   ;;  %37 = vperm.xlu1 %231, %v31_v8  }
   0xe   :  { %125 = vperm.xlu2 %232, %v111_v19  }
  0x13   :  { %217 = vmatmul.msk.f32.gmra.mxu0 %vm55_vm1, %v29_v9 }
  0x14   :  { %120 = vperm.xlu0 %230, %v110_v10   ;;  %115 = vperm.xlu1 %231, %v109_v11  }
  0x16   :  { %183 = vperm.xlu2 %232, %v180_v27  }
  0x60   :  { %v131_v35 = vpop.permute.xlu2 %130 }
  0x68   :  { %v126_v38 = vpop.permute.xlu2 %125 }
  0x70   :  { %v184_v52 = vpop.permute.xlu2 %183 }
  0x76   :  { %v53_v13 = vpop.permute.xlu0 %52  ;;  %v43_v14 = vpop.permute.xlu1 %42 }
  0x7e   :  { %v48_v21 = vpop.permute.xlu0 %47  ;;  %v38_v22 = vpop.permute.xlu1 %37 }
  0x80   :  { %v89_v12 = vpop.f32.mrf.mxu0 }
  0x81   :  { %v90_v26 = vadd.f32 %v89_v12, %v38_v22 }
  0x86   :  { %v98_v15 = vpop.f32.mrf.mxu2  ;;  %v121_v43 = vpop.permute.xlu0 %120 }
  0x87   :  { %v99_v16 = vadd.f32 %v98_v15, %v53_v13  ;;  %v116_v45 = vpop.permute.xlu1 %115 }
  0x88   :  { %v92_v18 = vpop.f32.mrf.mxu0 }
  0x89   :  { %233 = vtanh.f32 %v99_v16  ;;  %v93_v24 = vadd.f32 %v92_v18, %v43_v14 }
  0x8f   :  { %v234_v20 = vpop.eup %233 }
  0x90   :  { %v95_v23 = vpop.f32.mrf.mxu0  ;;  %158 = vmatpush.msra.mxu1 %v234_v20  ;;  %225 = vmatpush.msra.mxu3 %v234_v20 }
  0x91   :  { %v96_v25 = vadd.f32 %v95_v23, %v48_v21 }
  0x93   :  { %235 = vtanh.f32 %v96_v25 }
  0x94   :  { %237 = vtanh.f32 %v93_v24 }
  0x95   :  { %239 = vtanh.f32 %v90_v26 }
  0x99   :  { %v236_v28 = vpop.eup %235 }
  0x9a   :  { %159 = vmatpush.msra.mxu1 %v236_v28  ;;  %226 = vmatpush.msra.mxu3 %v236_v28  ;;  %v238_v29 = vpop.eup %237 }
  0x9b   :  { %v240_v32 = vpop.eup %239 }
  0x9c   :  { %160 = vmatpush.msra.mxu1 %v238_v29  ;;  %227 = vmatpush.msra.mxu3 %v238_v29 }
  0x9e   :  { %161 = vmatpush.msra.mxu1 %v240_v32  ;;  %228 = vmatpush.msra.mxu3 %v240_v32 }
  0x9f   :  { %219 = vmatmul.msk.f32.vlgmr.msra.gmra.mxu1 %vm133_vm2, %v105_v30  ;;  %221 = vmatmul.msk.f32.vlgmr.msra.gmra.mxu3 %vm133_vm2, %v107_v31 }
  0xa7   :  { %220 = vmatmul.msk.f32.gmra.mxu1 %vm133_vm2, %v106_v33  ;;  %222 = vmatmul.msk.f32.gmra.mxu3 %vm133_vm2, %v108_v34 }
 0x11c   :  { %v163_v36 = vpop.f32.mrf.mxu1 }
 0x11d   :  { %v164_v46 = vadd.f32 %v163_v36, %v116_v45 }
 0x122   :  { %v169_v37 = vpop.f32.mrf.mxu3 }
 0x123   :  { %v170_v41 = vadd.f32 %v169_v37, %v126_v38 }
 0x124   :  { %v166_v39 = vpop.f32.mrf.mxu1 }
 0x125   :  { %v167_v44 = vadd.f32 %v166_v39, %v121_v43 }
 0x12a   :  { %v172_v40 = vpop.f32.mrf.mxu3 }
 0x12b   :  { %v173_v42 = vadd.f32 %v172_v40, %v131_v35 }
 0x12d   :  { %241 = vtanh.f32 %v173_v42 }
 0x12e   :  { %243 = vtanh.f32 %v170_v41 }
 0x12f   :  { %245 = vtanh.f32 %v167_v44 }
 0x130   :  { %247 = vtanh.f32 %v164_v46 }
 0x133   :  { %v242_v47 = vpop.eup %241 }
 0x134   :  { %201 = vmatpush.msrb.mxu2 %v242_v47  ;;  %v244_v48 = vpop.eup %243 }
 0x135   :  { %v246_v49 = vpop.eup %245 }
 0x136   :  { %202 = vmatpush.msrb.mxu2 %v244_v48  ;;  %v248_v51 = vpop.eup %247 }
 0x138   :  { %203 = vmatpush.msrb.mxu2 %v246_v49 }
 0x13a   :  { %204 = vmatpush.msrb.mxu2 %v248_v51 }
 0x13b   :  { %223 = vmatmul.msk.f32.vlgmr.msrb.gmra.mxu2 %vm133_vm2, %v179_v50 }
 0x1be   :  { %v206_v53 = vpop.f32.mrf.mxu2 }
 0x1bf   :  { %v207_v54 = vadd.f32 %v206_v53, %v184_v52 }
 0x1c1   :  { %209 = vst [vmem:[%s366_s7] sm:$0xff] %v207_v54 }

</bundles_post_ra>
